<compile_context>
chip_gen: v6e
topology: v6e:2x2x1
jax: 0.10.0
libtpu: 0.0.40
codegen_flags: <defaults>
</compile_context>

<pallas_src>
import functools

import jax
import jax.numpy as jnp
from jax.experimental import pallas as pl
from jax.experimental.pallas import tpu as pltpu


def _round_up(n: int, m: int) -> int:
    return pl.cdiv(n, m) * m


def mlp_kernel(x_ref, w1_ref, b1_ref, w2_ref, b2_ref, w3_ref, b3_ref, o_ref):
    compute_dtype = w1_ref.dtype

    # Layer 1: MXU matmul (bf16 in, f32 accumulate), bias + ReLU in f32 on the VPU.
    h1 = jnp.dot(x_ref[...], w1_ref[...], preferred_element_type=jnp.float32)
    h1 = jnp.maximum(h1 + b1_ref[...], 0.0)          # b1 is (1, H1) -> broadcasts

    # Layer 2
    h2 = jnp.dot(h1.astype(compute_dtype), w2_ref[...],
                 preferred_element_type=jnp.float32)
    h2 = jnp.maximum(h2 + b2_ref[...], 0.0)

    # Output layer (no activation)
    out = jnp.dot(h2.astype(compute_dtype), w3_ref[...],
                  preferred_element_type=jnp.float32)
    o_ref[...] = (out + b3_ref[...]).astype(o_ref.dtype)


@functools.partial(jax.jit, static_argnames=("block_batch", "compute_dtype"))
def simple_mlp_forward(x, w1, b1, w2, b2, w3, b3, *,
                       block_batch: int = 128,
                       compute_dtype=jnp.bfloat16):
    """x: (B, D_in) f32; w_i: (in, out) f32; b_i: (1, out) f32. Returns (B, D_out) f32."""
    B, D_in = x.shape
    H1 = w1.shape[1]
    H2 = w2.shape[1]
    D_out = w3.shape[1]

    LANE = 128
    # Sublane granularity of the MXU-input dtype (bf16 packs 16 rows per vreg).
    SUB = 16 if compute_dtype == jnp.bfloat16 else 8

    # Lane-dense padded feature dims.
    D_in_p = _round_up(D_in, LANE)
    H1_p = _round_up(H1, LANE)
    H2_p = _round_up(H2, LANE)
    D_out_p = _round_up(D_out, LANE)

    # Batch tile: multiple of the sublane packing; pad batch up to a whole number of tiles.
    TB = min(block_batch, _round_up(B, SUB))
    TB = _round_up(TB, SUB)
    B_p = _round_up(B, TB)
    n_batch_blocks = B_p // TB

    def pad2(a, rows, cols, dtype):
        return jnp.pad(a, ((0, rows - a.shape[0]), (0, cols - a.shape[1]))).astype(dtype)

    # bf16 (or chosen compute dtype) for everything that feeds the MXU; biases stay f32.
    x_p = pad2(x, B_p, D_in_p, compute_dtype)
    w1_p = pad2(w1, D_in_p, H1_p, compute_dtype)
    w2_p = pad2(w2, H1_p, H2_p, compute_dtype)
    w3_p = pad2(w3, H2_p, D_out_p, compute_dtype)
    b1_p = pad2(b1, 1, H1_p, jnp.float32)
    b2_p = pad2(b2, 1, H2_p, jnp.float32)
    b3_p = pad2(b3, 1, D_out_p, jnp.float32)

    # Weights / biases: constant index_map -> DMA'd once, VMEM-resident across the grid.
    pinned = lambda a: pl.BlockSpec(a.shape, lambda i: (0,) * a.ndim)

    out_padded = pl.pallas_call(
        mlp_kernel,
        out_shape=jax.ShapeDtypeStruct((B_p, D_out_p), jnp.float32),
        grid_spec=pl.GridSpec(
            grid=(n_batch_blocks,),
            in_specs=[
                pl.BlockSpec((TB, D_in_p), lambda i: (i, 0)),   # x: tiled over batch
                pinned(w1_p), pinned(b1_p),
                pinned(w2_p), pinned(b2_p),
                pinned(w3_p), pinned(b3_p),
            ],
            out_specs=pl.BlockSpec((TB, D_out_p), lambda i: (i, 0)),
        ),
        compiler_params=pltpu.CompilerParams(
            dimension_semantics=("parallel",),   # shards batch tiles across TCs on v7x
        ),
    )(x_p, w1_p, b1_p, w2_p, b2_p, w3_p, b3_p)

    # Slice padded batch rows and padded output lanes back off.
    return out_padded[:B, :D_out]


# ----------------------------------------------------------------------------
# Initializers matching the PyTorch module's init_weights()
# ----------------------------------------------------------------------------
def xavier_uniform(key, fan_in, fan_out, dtype=jnp.float32):
    # Matches torch.nn.init.xavier_uniform_ (gain=1); stored transposed as (in, out).
    limit = jnp.sqrt(6.0 / (fan_in + fan_out))
    return jax.random.uniform(key, (fan_in, fan_out), dtype, -limit, limit)


def kaiming_uniform_linear_default(key, fan_in, fan_out, dtype=jnp.float32):
    # PyTorch nn.Linear default weight init: kaiming_uniform_(a=sqrt(5))
    # => uniform(-1/sqrt(fan_in), 1/sqrt(fan_in)).
    limit = 1.0 / jnp.sqrt(jnp.asarray(fan_in, dtype))
    return jax.random.uniform(key, (fan_in, fan_out), dtype, -limit, limit)


if __name__ == "__main__":
    # Small shapes implied by the module: flat feature vectors through 3 Linear layers.
    batch = 8
    input_shape = 32
    hidden_units1 = 64
    hidden_units2 = 48
    output_shape = 16

    key = jax.random.PRNGKey(0)
    kx, k1, k2, k3 = jax.random.split(key, 4)

    x = jax.random.normal(kx, (batch, input_shape), jnp.float32)

    # hidden_layer_1: default PyTorch Linear weight init (not overwritten when
    # weights_path=None since init_weights skips hidden_layer_1[0]).
    # TODO(synk): PyTorch's default bias init is uniform(-1/sqrt(fan_in), ...); zeros used for determinism.
    w1 = kaiming_uniform_linear_default(k1, input_shape, hidden_units1)
    b1 = jnp.zeros((1, hidden_units1), jnp.float32)

    # Remaining Linear layers: xavier_uniform weights, zero bias (per init_weights).
    w2 = xavier_uniform(k2, hidden_units1, hidden_units2)
    b2 = jnp.zeros((1, hidden_units2), jnp.float32)
    w3 = xavier_uniform(k3, hidden_units2, output_shape)
    b3 = jnp.zeros((1, output_shape), jnp.float32)

    out = simple_mlp_forward(x, w1, b1, w2, b2, w3, b3)
    out = jax.block_until_ready(out)
    assert out.shape == (batch, output_shape)
    assert out.dtype == jnp.float32

    # Reference #1: same bf16-input / f32-accumulate recipe as the kernel (tight check).
    cd = jnp.bfloat16
    h1 = jnp.maximum(
        jnp.dot(x.astype(cd), w1.astype(cd), preferred_element_type=jnp.float32) + b1, 0.0)
    h2 = jnp.maximum(
        jnp.dot(h1.astype(cd), w2.astype(cd), preferred_element_type=jnp.float32) + b2, 0.0)
    ref_bf16 = jnp.dot(h2.astype(cd), w3.astype(cd),
                       preferred_element_type=jnp.float32) + b3
    assert jnp.allclose(out, ref_bf16, atol=2e-3, rtol=2e-3)

    # Reference #2: pure f32 math (sanity check that bf16 MXU inputs stay close).
    ref_f32 = jnp.maximum(x @ w1 + b1, 0.0)
    ref_f32 = jnp.maximum(ref_f32 @ w2 + b2, 0.0)
    ref_f32 = ref_f32 @ w3 + b3
    assert jnp.allclose(out, ref_f32, atol=3e-2, rtol=3e-2)

    print("KERNEL_OK")
</pallas_src>

<mosaic_0001>
module attributes {stable_mosaic.version = 11 : i64} {
  func.func @mlp_kernel(%arg0: i32, %arg1: memref<16x128xbf16, #tpu.memory_space<vmem>>, %arg2: memref<128x128xbf16, #tpu.memory_space<vmem>>, %arg3: memref<1x128xf32, #tpu.memory_space<vmem>>, %arg4: memref<128x128xbf16, #tpu.memory_space<vmem>>, %arg5: memref<1x128xf32, #tpu.memory_space<vmem>>, %arg6: memref<128x128xbf16, #tpu.memory_space<vmem>>, %arg7: memref<1x128xf32, #tpu.memory_space<vmem>>, %arg8: memref<16x128xf32, #tpu.memory_space<vmem>>) attributes {dimension_semantics = [#tpu.dimension_semantics<parallel>], iteration_bounds = array<i64: 1>, scalar_prefetch = 0 : i64, scratch_operands = 0 : i64, tpu.core_type = #tpu.core_type<tc>, window_params = [{transform_indices = @transform_0, window_bounds = array<i64: 16, 128>}, {pipeline_mode = #tpu.pipeline_mode<synchronous>, transform_indices = @transform_1, window_bounds = array<i64: 128, 128>}, {pipeline_mode = #tpu.pipeline_mode<synchronous>, transform_indices = @transform_2, window_bounds = array<i64: 1, 128>}, {pipeline_mode = #tpu.pipeline_mode<synchronous>, transform_indices = @transform_3, window_bounds = array<i64: 128, 128>}, {pipeline_mode = #tpu.pipeline_mode<synchronous>, transform_indices = @transform_4, window_bounds = array<i64: 1, 128>}, {pipeline_mode = #tpu.pipeline_mode<synchronous>, transform_indices = @transform_5, window_bounds = array<i64: 128, 128>}, {pipeline_mode = #tpu.pipeline_mode<synchronous>, transform_indices = @transform_6, window_bounds = array<i64: 1, 128>}, {transform_indices = @transform_7, window_bounds = array<i64: 16, 128>}]} {
    %c0 = arith.constant 0 : index
    %c0_0 = arith.constant 0 : index
    %0 = vector.load %arg1[%c0, %c0_0] : memref<16x128xbf16, #tpu.memory_space<vmem>>, vector<16x128xbf16>
    %c0_1 = arith.constant 0 : index
    %c0_2 = arith.constant 0 : index
    %1 = vector.load %arg2[%c0_1, %c0_2] : memref<128x128xbf16, #tpu.memory_space<vmem>>, vector<128x128xbf16>
    %cst = arith.constant dense<0.000000e+00> : vector<16x128xf32>
    %2 = tpu.matmul %0, %1, %cst {dimension_numbers = #tpu.dot_dimension_numbers<[1], [0], [0], [1], [0, 0, 1, 1], [], []>} : vector<16x128xbf16>, vector<128x128xbf16>, vector<16x128xf32> -> vector<16x128xf32>
    %c0_3 = arith.constant 0 : index
    %c0_4 = arith.constant 0 : index
    %3 = vector.load %arg3[%c0_3, %c0_4] : memref<1x128xf32, #tpu.memory_space<vmem>>, vector<1x128xf32>
    %4 = vector.broadcast %3 : vector<1x128xf32> to vector<16x128xf32>
    %5 = arith.addf %2, %4 : vector<16x128xf32>
    %cst_5 = arith.constant 0.000000e+00 : f32
    %6 = vector.broadcast %cst_5 : f32 to vector<16x128xf32>
    %7 = arith.maximumf %5, %6 : vector<16x128xf32>
    %8 = arith.truncf %7 : vector<16x128xf32> to vector<16x128xbf16>
    %c0_6 = arith.constant 0 : index
    %c0_7 = arith.constant 0 : index
    %9 = vector.load %arg4[%c0_6, %c0_7] : memref<128x128xbf16, #tpu.memory_space<vmem>>, vector<128x128xbf16>
    %cst_8 = arith.constant dense<0.000000e+00> : vector<16x128xf32>
    %10 = tpu.matmul %8, %9, %cst_8 {dimension_numbers = #tpu.dot_dimension_numbers<[1], [0], [0], [1], [0, 0, 1, 1], [], []>} : vector<16x128xbf16>, vector<128x128xbf16>, vector<16x128xf32> -> vector<16x128xf32>
    %c0_9 = arith.constant 0 : index
    %c0_10 = arith.constant 0 : index
    %11 = vector.load %arg5[%c0_9, %c0_10] : memref<1x128xf32, #tpu.memory_space<vmem>>, vector<1x128xf32>
    %12 = vector.broadcast %11 : vector<1x128xf32> to vector<16x128xf32>
    %13 = arith.addf %10, %12 : vector<16x128xf32>
    %cst_11 = arith.constant 0.000000e+00 : f32
    %14 = vector.broadcast %cst_11 : f32 to vector<16x128xf32>
    %15 = arith.maximumf %13, %14 : vector<16x128xf32>
    %16 = arith.truncf %15 : vector<16x128xf32> to vector<16x128xbf16>
    %c0_12 = arith.constant 0 : index
    %c0_13 = arith.constant 0 : index
    %17 = vector.load %arg6[%c0_12, %c0_13] : memref<128x128xbf16, #tpu.memory_space<vmem>>, vector<128x128xbf16>
    %cst_14 = arith.constant dense<0.000000e+00> : vector<16x128xf32>
    %18 = tpu.matmul %16, %17, %cst_14 {dimension_numbers = #tpu.dot_dimension_numbers<[1], [0], [0], [1], [0, 0, 1, 1], [], []>} : vector<16x128xbf16>, vector<128x128xbf16>, vector<16x128xf32> -> vector<16x128xf32>
    %c0_15 = arith.constant 0 : index
    %c0_16 = arith.constant 0 : index
    %19 = vector.load %arg7[%c0_15, %c0_16] : memref<1x128xf32, #tpu.memory_space<vmem>>, vector<1x128xf32>
    %20 = vector.broadcast %19 : vector<1x128xf32> to vector<16x128xf32>
    %21 = arith.addf %18, %20 : vector<16x128xf32>
    %c0_17 = arith.constant 0 : index
    %c0_18 = arith.constant 0 : index
    %22 = vector.load %arg8[%c0_17, %c0_18] : memref<16x128xf32, #tpu.memory_space<vmem>>, vector<16x128xf32>
    tpu.vector_store %arg8[%c0_17, %c0_18], %21 {strides = array<i32>} : memref<16x128xf32, #tpu.memory_space<vmem>>, vector<16x128xf32>,
    return
  }
  func.func @transform_0(%arg0: i32) -> (i32, i32) {
    %c0_i32 = arith.constant 0 : i32
    %c0_i32_0 = arith.constant 0 : i32
    return %arg0, %c0_i32 : i32, i32
  }
  func.func @transform_1(%arg0: i32) -> (i32, i32) {
    %c0_i32 = arith.constant 0 : i32
    %c0_i32_0 = arith.constant 0 : i32
    %c0_i32_1 = arith.constant 0 : i32
    return %c0_i32, %c0_i32_0 : i32, i32
  }
  func.func @transform_2(%arg0: i32) -> (i32, i32) {
    %c0_i32 = arith.constant 0 : i32
    %c0_i32_0 = arith.constant 0 : i32
    %c0_i32_1 = arith.constant 0 : i32
    return %c0_i32, %c0_i32_0 : i32, i32
  }
  func.func @transform_3(%arg0: i32) -> (i32, i32) {
    %c0_i32 = arith.constant 0 : i32
    %c0_i32_0 = arith.constant 0 : i32
    %c0_i32_1 = arith.constant 0 : i32
    return %c0_i32, %c0_i32_0 : i32, i32
  }
  func.func @transform_4(%arg0: i32) -> (i32, i32) {
    %c0_i32 = arith.constant 0 : i32
    %c0_i32_0 = arith.constant 0 : i32
    %c0_i32_1 = arith.constant 0 : i32
    return %c0_i32, %c0_i32_0 : i32, i32
  }
  func.func @transform_5(%arg0: i32) -> (i32, i32) {
    %c0_i32 = arith.constant 0 : i32
    %c0_i32_0 = arith.constant 0 : i32
    %c0_i32_1 = arith.constant 0 : i32
    return %c0_i32, %c0_i32_0 : i32, i32
  }
  func.func @transform_6(%arg0: i32) -> (i32, i32) {
    %c0_i32 = arith.constant 0 : i32
    %c0_i32_0 = arith.constant 0 : i32
    %c0_i32_1 = arith.constant 0 : i32
    return %c0_i32, %c0_i32_0 : i32, i32
  }
  func.func @transform_7(%arg0: i32) -> (i32, i32) {
    %c0_i32 = arith.constant 0 : i32
    %c0_i32_0 = arith.constant 0 : i32
    return %arg0, %c0_i32 : i32, i32
  }
}

</mosaic_0001>

<bundles_post_ra>
// kernel: simple_mlp_forward.1
= control target key start
LH: loop header
LB: loop body
LE: loop exit
PB: predicated region body
PF: predicated region fallthrough
CT: control target
= control target key end

     0   :  { %v525_v0 = vmov 0.0   ;;  %vm526_vm0 = vmmov 0   ;;  %s687_s1 = inlined_call_operand.vmem [shape: bf16[128,128], index: 1, kind: input, shape index: {}]   ;;  %s688_s3 = inlined_call_operand.vmem [shape: bf16[128,128], index: 3, kind: input, shape index: {}]   ;;  %s689_s0 = inlined_call_operand.vmem [shape: bf16[16,128], index: 0, kind: input, shape index: {}]   ;;  %s690_s5 = inlined_call_operand.vmem [shape: bf16[128,128], index: 5, kind: input, shape index: {}]   ;;  %s691_s2 = inlined_call_operand.vmem [shape: f32[1,128], index: 2, kind: input, shape index: {}]   ;;  %s692_s4 = inlined_call_operand.vmem [shape: f32[1,128], index: 4, kind: input, shape index: {}]   ;;  %s693_s6 = inlined_call_operand.vmem [shape: f32[1,128], index: 6, kind: input, shape index: {}]   ;;  %s694_s7 = inlined_call_operand.vmem [shape: f32[16,128], index: 7, kind: output, shape index: {}]  }
   0x1   :  { %438 = vmatprep.subr.bf16.mxu0 %v525_v0  ;;  %v500_v1 = vld [vmem:[%s687_s1 + $0x38] sm:$0xff]   ;;  %454 = vmatprep.mubr.msk.bf16.mxu0 %vm526_vm0, %v525_v0  ;;  %v501_v2 = vld [vmem:[%s687_s1 + $0x30] sm:$0xff]   ;;  %v502_v3 = vld [vmem:[%s687_s1 + $0x28] sm:$0xff]  }
   0x2   :  { %458 = vmatprep.subr.bf16.mxu1 %v525_v0  ;;  %474 = vmatprep.mubr.msk.bf16.mxu1 %vm526_vm0, %v525_v0  ;;  %v509_v4 = vld [vmem:[%s688_s3 + $0x38] sm:$0xff]   ;;  %v503_v5 = vld [vmem:[%s687_s1 + $0x20] sm:$0xff]   ;;  %v510_v6 = vld [vmem:[%s688_s3 + $0x30] sm:$0xff]  }
   0x3   :  { %439 = vmatpush3.bf16.msra.mxu0 %v500_v1  ;;  %459 = vmatpush3.bf16.msra.mxu1 %v509_v4  ;;  %v504_v7 = vld [vmem:[%s687_s1 + $0x18] sm:$0xff]   ;;  %v511_v8 = vld [vmem:[%s688_s3 + $0x28] sm:$0xff]   ;;  %v505_v9 = vld [vmem:[%s687_s1 + $0x10] sm:$0xff]  }
   0x4   :  { %440 = vmatprep.subr.bf16.mxu0 %v525_v0  ;;  %460 = vmatprep.subr.bf16.mxu1 %v525_v0  ;;  %v512_v10 = vld [vmem:[%s688_s3 + $0x20] sm:$0xff]   ;;  %v506_v11 = vld [vmem:[%s687_s1 + $0x8] sm:$0xff]   ;;  %v513_v12 = vld [vmem:[%s688_s3 + $0x18] sm:$0xff]  }
   0x5   :  { %v507_v13 = vld [vmem:[%s687_s1] sm:$0xff]   ;;  %v514_v15 = vld [vmem:[%s688_s3 + $0x10] sm:$0xff]   ;;  %v515_v16 = vld [vmem:[%s688_s3 + $0x8] sm:$0xff]  }
   0x6   :  { %v508_v14 = vld [vmem:[%s689_s0] sm:$0xff]   ;;  %v517_v18 = vld [vmem:[%s690_s5 + $0x38] sm:$0xff]   ;;  %v518_v19 = vld [vmem:[%s690_s5 + $0x30] sm:$0xff]  }
   0x7   :  { %441 = vmatpush3.bf16.msra.mxu0 %v501_v2  ;;  %461 = vmatpush3.bf16.msra.mxu1 %v510_v6  ;;  %v516_v17 = vld [vmem:[%s688_s3] sm:$0xff]   ;;  %v519_v20 = vld [vmem:[%s690_s5 + $0x28] sm:$0xff]   ;;  %v521_v22 = vld [vmem:[%s690_s5 + $0x18] sm:$0xff]  }
   0x8   :  { %442 = vmatprep.subr.bf16.mxu0 %v525_v0  ;;  %462 = vmatprep.subr.bf16.mxu1 %v525_v0  ;;  %v520_v21 = vld [vmem:[%s690_s5 + $0x20] sm:$0xff]   ;;  %v522_v33 = vld [vmem:[%s690_s5 + $0x10] sm:$0xff]   ;;  %v523_v34 = vld [vmem:[%s690_s5 + $0x8] sm:$0xff]  }
   0x9   :  { %v383_v23 = vld [vmem:[%s691_s2] ss:$0 sm:$0xff] }
   0xa   :  { %v524_v35 = vld [vmem:[%s690_s5] sm:$0xff]  }
   0xb   :  { %443 = vmatpush3.bf16.msra.mxu0 %v502_v3  ;;  %463 = vmatpush3.bf16.msra.mxu1 %v511_v8  ;;  %v393_v36 = vld [vmem:[%s692_s4] ss:$0 sm:$0xff] }
   0xc   :  { %444 = vmatprep.subr.bf16.mxu0 %v525_v0  ;;  %464 = vmatprep.subr.bf16.mxu1 %v525_v0  ;;  %v402_v46 = vld [vmem:[%s693_s6] ss:$0 sm:$0xff] }
   0xf   :  { %445 = vmatpush3.bf16.msra.mxu0 %v503_v5  ;;  %465 = vmatpush3.bf16.msra.mxu1 %v512_v10 }
  0x10   :  { %446 = vmatprep.subr.bf16.mxu0 %v525_v0  ;;  %466 = vmatprep.subr.bf16.mxu1 %v525_v0 }
  0x13   :  { %447 = vmatpush3.bf16.msra.mxu0 %v504_v7  ;;  %467 = vmatpush3.bf16.msra.mxu1 %v513_v12 }
  0x14   :  { %448 = vmatprep.subr.bf16.mxu0 %v525_v0  ;;  %468 = vmatprep.subr.bf16.mxu1 %v525_v0 }
  0x17   :  { %449 = vmatpush3.bf16.msra.mxu0 %v505_v9  ;;  %469 = vmatpush3.bf16.msra.mxu1 %v514_v15 }
  0x18   :  { %450 = vmatprep.subr.bf16.mxu0 %v525_v0  ;;  %470 = vmatprep.subr.bf16.mxu1 %v525_v0 }
  0x1b   :  { %451 = vmatpush3.bf16.msra.mxu0 %v506_v11  ;;  %471 = vmatpush3.bf16.msra.mxu1 %v515_v16 }
  0x1c   :  { %452 = vmatprep.subr.bf16.mxu0 %v525_v0  ;;  %472 = vmatprep.subr.bf16.mxu1 %v525_v0 }
  0x1f   :  { %453 = vmatpush3.bf16.msra.mxu0 %v507_v13  ;;  %473 = vmatpush3.bf16.msra.mxu1 %v516_v17 }
  0x20   :  { %478 = vmatprep.subr.bf16.mxu0 %v525_v0 }
  0x22   :  { %455 = vmatmul.mubr.bf16.vlgmr.msra.gmra.mxu0 %v508_v14 }
  0x23   :  { %494 = vmatprep.mubr.msk.bf16.mxu0 %vm526_vm0, %v525_v0  ;;  %479 = vmatpush3.bf16.msra.mxu0 %v517_v18 }
  0x24   :  { %480 = vmatprep.subr.bf16.mxu0 %v525_v0 }
  0x27   :  { %481 = vmatpush3.bf16.msra.mxu0 %v518_v19 }
  0x28   :  { %482 = vmatprep.subr.bf16.mxu0 %v525_v0 }
  0x2b   :  { %483 = vmatpush3.bf16.msra.mxu0 %v519_v20 }
  0x2c   :  { %484 = vmatprep.subr.bf16.mxu0 %v525_v0 }
  0x2f   :  { %485 = vmatpush3.bf16.msra.mxu0 %v520_v21 }
  0x30   :  { %486 = vmatprep.subr.bf16.mxu0 %v525_v0 }
  0x33   :  { %487 = vmatpush3.bf16.msra.mxu0 %v521_v22 }
  0x34   :  { %488 = vmatprep.subr.bf16.mxu0 %v525_v0 }
  0x37   :  { %489 = vmatpush3.bf16.msra.mxu0 %v522_v33 }
  0x38   :  { %490 = vmatprep.subr.bf16.mxu0 %v525_v0 }
  0x3b   :  { %491 = vmatpush3.bf16.msra.mxu0 %v523_v34 }
  0x3c   :  { %492 = vmatprep.subr.bf16.mxu0 %v525_v0 }
  0x3f   :  { %493 = vmatpush3.bf16.msra.mxu0 %v524_v35 }
  0xe2   :  { %v140_v24 = vpop.f32.mrf.mxu0 }
  0xe3   :  { %v141_v26 = vadd.f32 %v383_v23, %v140_v24 }
  0xe4   :  { %v456_v25 = vpop.f32.mrf.mxu0 }
  0xe5   :  { %v147_v30 = vmax.f32 %v141_v26, 0.0 }
  0xe6   :  { %v143_v27 = vpop.f32.mrf.mxu0 }
  0xe7   :  { %v144_v28 = vadd.f32 %v383_v23, %v143_v27 }
  0xe8   :  { %v457_v29 = vpop.f32.mrf.mxu0 }
  0xe9   :  { %v148_v31 = vmax.f32 %v144_v28, 0.0 }
  0xeb   :  { %v149_v32 = vpack.c.bf16 %v148_v31, %v147_v30 }
  0xed   :  { %475 = vmatmul.mubr.bf16.vlgmr.msra.gmra.mxu1 %v149_v32 }
 0x1ad   :  { %v255_v37 = vpop.f32.mrf.mxu1 }
 0x1ae   :  { %v256_v39 = vadd.f32 %v393_v36, %v255_v37 }
 0x1af   :  { %v476_v38 = vpop.f32.mrf.mxu1 }
 0x1b0   :  { %v262_v43 = vmax.f32 %v256_v39, 0.0 }
 0x1b1   :  { %v258_v40 = vpop.f32.mrf.mxu1 }
 0x1b2   :  { %v259_v41 = vadd.f32 %v393_v36, %v258_v40 }
 0x1b3   :  { %v477_v42 = vpop.f32.mrf.mxu1 }
 0x1b4   :  { %v263_v44 = vmax.f32 %v259_v41, 0.0 }
 0x1b6   :  { %v264_v45 = vpack.c.bf16 %v263_v44, %v262_v43 }
 0x1b8   :  { %495 = vmatmul.mubr.bf16.vlgmr.msra.gmra.mxu0 %v264_v45 }
 0x278   :  { %v370_v47 = vpop.f32.mrf.mxu0 }
 0x279   :  { %v371_v48 = vadd.f32 %v402_v46, %v370_v47 }
 0x27a   :  { %v496_v49 = vpop.f32.mrf.mxu0 }
 0x27b   :  { %377 = vst [vmem:[%s694_s7] sm:$0xff] %v371_v48 }
 0x27c   :  { %v373_v50 = vpop.f32.mrf.mxu0 }
 0x27d   :  { %v374_v51 = vadd.f32 %v402_v46, %v373_v50 }
 0x27e   :  { %v497_v52 = vpop.f32.mrf.mxu0 }
 0x27f   :  { %378 = vst [vmem:[%s694_s7 + $0x8] sm:$0xff] %v374_v51 }

</bundles_post_ra>
